<compile_context>
chip_gen: v7x
topology: tpu7x:2x2x1
jax: 0.10.0
libtpu: 0.0.40
codegen_flags: <defaults>
</compile_context>

<pallas_src>
import jax
import jax.numpy as jnp
from jax.experimental import pallas as pl
from jax.experimental.pallas import tpu as pltpu

# ---------------- module hyper-parameters (defaults of SpecAugment.__init__) --
TIME_MASK_MAX_LENGTH = 30
P_MAX = 1.0
N_TIME_MASK = 10
FREQ_MASK_MAX_LENGTH = 50
N_FREQ_MASK = 2
# use_time_stretch=False -> TimeStretch branch is never built / never run.
# TODO(synk): TimeStretch (complex-spectrogram phase vocoder) not implemented;
# the default forward path (use_time_stretch=False) does not use it.


def _specaug_kernel(t_start_ref, t_end_ref, f_start_ref, f_end_ref,
                    x_ref, o_ref):
    """Zero [t_start, t_end) time rows and [f_start, f_end) freq cols."""
    x = x_ref[...]
    tt, ff = x.shape
    t0 = pl.program_id(0) * tt  # global time offset of this tile

    # Separable 1-D keeps: time-mask compares on a (tt, 1) column, freq-mask
    # compares on a (1, ff) row.  Only the final combine is full-width.
    t_idx = jax.lax.broadcasted_iota(jnp.int32, (tt, 1), 0) + t0
    f_idx = jax.lax.broadcasted_iota(jnp.int32, (1, ff), 1)

    keep_t = jnp.ones((tt, 1), dtype=jnp.bool_)
    for i in range(N_TIME_MASK):      # unrolled, static trip count (SMEM reads)
        keep_t &= ~((t_idx >= t_start_ref[i]) & (t_idx < t_end_ref[i]))
    keep_f = jnp.ones((1, ff), dtype=jnp.bool_)
    for i in range(N_FREQ_MASK):
        keep_f &= ~((f_idx >= f_start_ref[i]) & (f_idx < f_end_ref[i]))

    if x.dtype.itemsize < 4 and jnp.issubdtype(x.dtype, jnp.floating):
        # v5e-friendly path for bf16/fp8: packed multiplies by masks cast to
        # x.dtype (casts act on the tiny 1-D keeps), avoiding a select that
        # would be widened to f32 on chips without a bf16 VPU datapath.
        o_ref[...] = x * keep_t.astype(x.dtype) * keep_f.astype(x.dtype)
    else:
        o_ref[...] = jnp.where(keep_t & keep_f, x, jnp.zeros((), x.dtype))


def _sample_masks(key, n_masks, mask_param, axis_len, p):
    """Replicates torchaudio.functional.mask_along_axis sampling.

    torchaudio source:
        value      = torch.rand(1) * mask_param
        min_value  = torch.rand(1) * (size - value)
        mask_start = min_value.long()
        mask_end   = min_value.long() + value.long()
    i.e. end = floor(min_value) + floor(value); we match that line exactly
    (note: this is torchaudio's formula, not floor(min_value + value)).
    """
    if p < 1.0:  # torchaudio._get_mask_param
        mask_param = min(mask_param, int(axis_len * p))
    if mask_param < 1:
        # torchaudio returns the input unchanged; encode as empty masks.
        z = jnp.zeros((n_masks,), jnp.int32)
        return z, z, key
    starts, ends = [], []
    for _ in range(n_masks):
        key, k1, k2 = jax.random.split(key, 3)
        value = jax.random.uniform(k1, (), jnp.float32) * mask_param
        min_value = jax.random.uniform(k2, (), jnp.float32) * (axis_len - value)
        start = jnp.floor(min_value).astype(jnp.int32)
        end = start + jnp.floor(value).astype(jnp.int32)
        starts.append(start)
        ends.append(end)
    return jnp.stack(starts), jnp.stack(ends), key


def _round_up(n, m):
    return ((n + m - 1) // m) * m


def _choose_tile_t(T, F, itemsize):
    """Pick the time-tile height.

    ~3 MiB per tile => ~12 MiB of VMEM with double-buffered input + output,
    comfortably under the default scoped limits (16 MiB v5e, 32 MiB v6e/v7x)
    and well inside v7x's 64 MiB physical VMEM.  Keep >= 2 grid steps when
    possible so the 'parallel' axis shards across v7x's two TensorCores.
    """
    sub = 8 * max(1, 4 // itemsize)   # min sublane tile: 8 f32, 16 bf16, 32 i8
    budget_bytes = 3 * 1024 * 1024
    max_rows = max(sub, (budget_bytes // (F * itemsize)) // sub * sub)
    if T <= sub:
        return T                      # single full-extent block
    half = _round_up(pl.cdiv(T, 2), sub)
    return max(sub, min(max_rows, half))


def spec_augment(x, key):
    """x: (T, F) float array.  Returns (masked array, mask params)."""
    T, F = x.shape

    # Forward order in the module: n_time_mask time masks then n_freq_mask freq
    # masks; randoms drawn in that order.  Masking to 0 is idempotent, so
    # applying all masks at once equals the module's sequential loop.
    t_starts, t_ends, key = _sample_masks(key, N_TIME_MASK,
                                          TIME_MASK_MAX_LENGTH, T, P_MAX)
    f_starts, f_ends, key = _sample_masks(key, N_FREQ_MASK,
                                          FREQ_MASK_MAX_LENGTH, F, 1.0)

    # Pad the freq (lane) dim to a multiple of 128 so output stores are
    # unmasked, lane-dense vst (matters most on v5e's single store slot).
    F_pad = _round_up(F, 128)
    xp = x if F_pad == F else jnp.pad(x, ((0, 0), (0, F_pad - F)))

    tile_t = _choose_tile_t(T, F_pad, xp.dtype.itemsize)
    grid = (pl.cdiv(T, tile_t),)      # ragged tail tile handled by Pallas

    out = pl.pallas_call(
        _specaug_kernel,
        out_shape=jax.ShapeDtypeStruct((T, F_pad), xp.dtype),
        grid_spec=pltpu.PrefetchScalarGridSpec(
            num_scalar_prefetch=4,
            grid=grid,
            in_specs=[pl.BlockSpec((tile_t, F_pad), lambda i, *_: (i, 0))],
            out_specs=pl.BlockSpec((tile_t, F_pad), lambda i, *_: (i, 0)),
        ),
        compiler_params=pltpu.CompilerParams(
            dimension_semantics=("parallel",)),
    )(t_starts, t_ends, f_starts, f_ends, xp)

    if F_pad != F:
        out = out[:, :F]
    return out, (t_starts, t_ends, f_starts, f_ends)


def _reference(x, t_starts, t_ends, f_starts, f_ends):
    """Pure-JAX reference of the same masking (sanity check)."""
    T, F = x.shape
    t_idx = jnp.arange(T)[:, None]
    f_idx = jnp.arange(F)[None, :]
    keep = jnp.ones((T, F), dtype=bool)
    for i in range(N_TIME_MASK):
        keep &= ~((t_idx >= t_starts[i]) & (t_idx < t_ends[i]))
    for i in range(N_FREQ_MASK):
        keep &= ~((f_idx >= f_starts[i]) & (f_idx < f_ends[i]))
    return jnp.where(keep, x, jnp.zeros((), x.dtype))


if __name__ == "__main__":
    key = jax.random.PRNGKey(0)

    # Case 1: nicely shaped (T, F) spectrogram.
    kx, kmask, key = jax.random.split(key, 3)
    T, F = 128, 256
    x = jax.random.normal(kx, (T, F), dtype=jnp.float32)
    y, mp = spec_augment(x, kmask)
    y = jax.block_until_ready(y)
    assert y.shape == x.shape and y.dtype == x.dtype
    assert jnp.allclose(y, _reference(x, *mp)), "case 1 mismatch vs reference"

    # Case 2: ragged shapes (T not a tile multiple, F not a lane multiple) --
    # exercises the cdiv tail tile and the freq-padding path (no assert now).
    kx2, kmask2 = jax.random.split(key)
    T2, F2 = 200, 200
    x2 = jax.random.normal(kx2, (T2, F2), dtype=jnp.float32)
    y2, mp2 = spec_augment(x2, kmask2)
    y2 = jax.block_until_ready(y2)
    assert y2.shape == x2.shape and y2.dtype == x2.dtype
    assert jnp.allclose(y2, _reference(x2, *mp2)), "case 2 mismatch vs reference"

    print("KERNEL_OK")
</pallas_src>

<mosaic_0001>
module attributes {stable_mosaic.version = 11 : i64} {
  func.func @_specaug_kernel(%arg0: i32, %arg1: memref<10xi32, #tpu.memory_space<smem>>, %arg2: memref<10xi32, #tpu.memory_space<smem>>, %arg3: memref<2xi32, #tpu.memory_space<smem>>, %arg4: memref<2xi32, #tpu.memory_space<smem>>, %arg5: memref<64x256xf32, #tpu.memory_space<vmem>>, %arg6: memref<64x256xf32, #tpu.memory_space<vmem>>) attributes {dimension_semantics = [#tpu.dimension_semantics<parallel>], iteration_bounds = array<i64: 2>, scalar_prefetch = 4 : i64, scratch_operands = 0 : i64, tpu.core_type = #tpu.core_type<tc>, window_params = [{transform_indices = @transform_0, window_bounds = array<i64: 64, 256>}, {transform_indices = @transform_1, window_bounds = array<i64: 64, 256>}]} {
    %c0 = arith.constant 0 : index
    %c0_0 = arith.constant 0 : index
    %0 = vector.load %arg5[%c0, %c0_0] : memref<64x256xf32, #tpu.memory_space<vmem>>, vector<64x256xf32>
    %c64_i32 = arith.constant 64 : i32
    %1 = arith.muli %arg0, %c64_i32 : i32
    %2 = tpu.iota {dimensions = array<i32: 0>} : vector<64x1xi32>
    %3 = vector.broadcast %1 : i32 to vector<64x1xi32>
    %4 = arith.addi %2, %3 : vector<64x1xi32>
    %5 = tpu.iota {dimensions = array<i32: 1>} : vector<1x256xi32>
    %true = arith.constant true
    %6 = vector.broadcast %true : i1 to vector<64x1xi1>
    %c0_1 = arith.constant 0 : index
    %7 = memref.load %arg1[%c0_1] : memref<10xi32, #tpu.memory_space<smem>>
    %8 = vector.broadcast %7 : i32 to vector<64x1xi32>
    %9 = arith.cmpi sge, %4, %8 : vector<64x1xi32>
    %c0_2 = arith.constant 0 : index
    %10 = memref.load %arg2[%c0_2] : memref<10xi32, #tpu.memory_space<smem>>
    %11 = vector.broadcast %10 : i32 to vector<64x1xi32>
    %12 = arith.cmpi slt, %4, %11 : vector<64x1xi32>
    %13 = arith.andi %9, %12 : vector<64x1xi1>
    %cst = arith.constant dense<true> : vector<64x1xi1>
    %14 = arith.xori %13, %cst : vector<64x1xi1>
    %15 = arith.andi %6, %14 : vector<64x1xi1>
    %c1 = arith.constant 1 : index
    %16 = memref.load %arg1[%c1] : memref<10xi32, #tpu.memory_space<smem>>
    %17 = vector.broadcast %16 : i32 to vector<64x1xi32>
    %18 = arith.cmpi sge, %4, %17 : vector<64x1xi32>
    %c1_3 = arith.constant 1 : index
    %19 = memref.load %arg2[%c1_3] : memref<10xi32, #tpu.memory_space<smem>>
    %20 = vector.broadcast %19 : i32 to vector<64x1xi32>
    %21 = arith.cmpi slt, %4, %20 : vector<64x1xi32>
    %22 = arith.andi %18, %21 : vector<64x1xi1>
    %cst_4 = arith.constant dense<true> : vector<64x1xi1>
    %23 = arith.xori %22, %cst_4 : vector<64x1xi1>
    %24 = arith.andi %15, %23 : vector<64x1xi1>
    %c2 = arith.constant 2 : index
    %25 = memref.load %arg1[%c2] : memref<10xi32, #tpu.memory_space<smem>>
    %26 = vector.broadcast %25 : i32 to vector<64x1xi32>
    %27 = arith.cmpi sge, %4, %26 : vector<64x1xi32>
    %c2_5 = arith.constant 2 : index
    %28 = memref.load %arg2[%c2_5] : memref<10xi32, #tpu.memory_space<smem>>
    %29 = vector.broadcast %28 : i32 to vector<64x1xi32>
    %30 = arith.cmpi slt, %4, %29 : vector<64x1xi32>
    %31 = arith.andi %27, %30 : vector<64x1xi1>
    %cst_6 = arith.constant dense<true> : vector<64x1xi1>
    %32 = arith.xori %31, %cst_6 : vector<64x1xi1>
    %33 = arith.andi %24, %32 : vector<64x1xi1>
    %c3 = arith.constant 3 : index
    %34 = memref.load %arg1[%c3] : memref<10xi32, #tpu.memory_space<smem>>
    %35 = vector.broadcast %34 : i32 to vector<64x1xi32>
    %36 = arith.cmpi sge, %4, %35 : vector<64x1xi32>
    %c3_7 = arith.constant 3 : index
    %37 = memref.load %arg2[%c3_7] : memref<10xi32, #tpu.memory_space<smem>>
    %38 = vector.broadcast %37 : i32 to vector<64x1xi32>
    %39 = arith.cmpi slt, %4, %38 : vector<64x1xi32>
    %40 = arith.andi %36, %39 : vector<64x1xi1>
    %cst_8 = arith.constant dense<true> : vector<64x1xi1>
    %41 = arith.xori %40, %cst_8 : vector<64x1xi1>
    %42 = arith.andi %33, %41 : vector<64x1xi1>
    %c4 = arith.constant 4 : index
    %43 = memref.load %arg1[%c4] : memref<10xi32, #tpu.memory_space<smem>>
    %44 = vector.broadcast %43 : i32 to vector<64x1xi32>
    %45 = arith.cmpi sge, %4, %44 : vector<64x1xi32>
    %c4_9 = arith.constant 4 : index
    %46 = memref.load %arg2[%c4_9] : memref<10xi32, #tpu.memory_space<smem>>
    %47 = vector.broadcast %46 : i32 to vector<64x1xi32>
    %48 = arith.cmpi slt, %4, %47 : vector<64x1xi32>
    %49 = arith.andi %45, %48 : vector<64x1xi1>
    %cst_10 = arith.constant dense<true> : vector<64x1xi1>
    %50 = arith.xori %49, %cst_10 : vector<64x1xi1>
    %51 = arith.andi %42, %50 : vector<64x1xi1>
    %c5 = arith.constant 5 : index
    %52 = memref.load %arg1[%c5] : memref<10xi32, #tpu.memory_space<smem>>
    %53 = vector.broadcast %52 : i32 to vector<64x1xi32>
    %54 = arith.cmpi sge, %4, %53 : vector<64x1xi32>
    %c5_11 = arith.constant 5 : index
    %55 = memref.load %arg2[%c5_11] : memref<10xi32, #tpu.memory_space<smem>>
    %56 = vector.broadcast %55 : i32 to vector<64x1xi32>
    %57 = arith.cmpi slt, %4, %56 : vector<64x1xi32>
    %58 = arith.andi %54, %57 : vector<64x1xi1>
    %cst_12 = arith.constant dense<true> : vector<64x1xi1>
    %59 = arith.xori %58, %cst_12 : vector<64x1xi1>
    %60 = arith.andi %51, %59 : vector<64x1xi1>
    %c6 = arith.constant 6 : index
    %61 = memref.load %arg1[%c6] : memref<10xi32, #tpu.memory_space<smem>>
    %62 = vector.broadcast %61 : i32 to vector<64x1xi32>
    %63 = arith.cmpi sge, %4, %62 : vector<64x1xi32>
    %c6_13 = arith.constant 6 : index
    %64 = memref.load %arg2[%c6_13] : memref<10xi32, #tpu.memory_space<smem>>
    %65 = vector.broadcast %64 : i32 to vector<64x1xi32>
    %66 = arith.cmpi slt, %4, %65 : vector<64x1xi32>
    %67 = arith.andi %63, %66 : vector<64x1xi1>
    %cst_14 = arith.constant dense<true> : vector<64x1xi1>
    %68 = arith.xori %67, %cst_14 : vector<64x1xi1>
    %69 = arith.andi %60, %68 : vector<64x1xi1>
    %c7 = arith.constant 7 : index
    %70 = memref.load %arg1[%c7] : memref<10xi32, #tpu.memory_space<smem>>
    %71 = vector.broadcast %70 : i32 to vector<64x1xi32>
    %72 = arith.cmpi sge, %4, %71 : vector<64x1xi32>
    %c7_15 = arith.constant 7 : index
    %73 = memref.load %arg2[%c7_15] : memref<10xi32, #tpu.memory_space<smem>>
    %74 = vector.broadcast %73 : i32 to vector<64x1xi32>
    %75 = arith.cmpi slt, %4, %74 : vector<64x1xi32>
    %76 = arith.andi %72, %75 : vector<64x1xi1>
    %cst_16 = arith.constant dense<true> : vector<64x1xi1>
    %77 = arith.xori %76, %cst_16 : vector<64x1xi1>
    %78 = arith.andi %69, %77 : vector<64x1xi1>
    %c8 = arith.constant 8 : index
    %79 = memref.load %arg1[%c8] : memref<10xi32, #tpu.memory_space<smem>>
    %80 = vector.broadcast %79 : i32 to vector<64x1xi32>
    %81 = arith.cmpi sge, %4, %80 : vector<64x1xi32>
    %c8_17 = arith.constant 8 : index
    %82 = memref.load %arg2[%c8_17] : memref<10xi32, #tpu.memory_space<smem>>
    %83 = vector.broadcast %82 : i32 to vector<64x1xi32>
    %84 = arith.cmpi slt, %4, %83 : vector<64x1xi32>
    %85 = arith.andi %81, %84 : vector<64x1xi1>
    %cst_18 = arith.constant dense<true> : vector<64x1xi1>
    %86 = arith.xori %85, %cst_18 : vector<64x1xi1>
    %87 = arith.andi %78, %86 : vector<64x1xi1>
    %c9 = arith.constant 9 : index
    %88 = memref.load %arg1[%c9] : memref<10xi32, #tpu.memory_space<smem>>
    %89 = vector.broadcast %88 : i32 to vector<64x1xi32>
    %90 = arith.cmpi sge, %4, %89 : vector<64x1xi32>
    %c9_19 = arith.constant 9 : index
    %91 = memref.load %arg2[%c9_19] : memref<10xi32, #tpu.memory_space<smem>>
    %92 = vector.broadcast %91 : i32 to vector<64x1xi32>
    %93 = arith.cmpi slt, %4, %92 : vector<64x1xi32>
    %94 = arith.andi %90, %93 : vector<64x1xi1>
    %cst_20 = arith.constant dense<true> : vector<64x1xi1>
    %95 = arith.xori %94, %cst_20 : vector<64x1xi1>
    %96 = arith.andi %87, %95 : vector<64x1xi1>
    %true_21 = arith.constant true
    %97 = vector.broadcast %true_21 : i1 to vector<1x256xi1>
    %c0_22 = arith.constant 0 : index
    %98 = memref.load %arg3[%c0_22] : memref<2xi32, #tpu.memory_space<smem>>
    %99 = vector.broadcast %98 : i32 to vector<1x256xi32>
    %100 = arith.cmpi sge, %5, %99 : vector<1x256xi32>
    %c0_23 = arith.constant 0 : index
    %101 = memref.load %arg4[%c0_23] : memref<2xi32, #tpu.memory_space<smem>>
    %102 = vector.broadcast %101 : i32 to vector<1x256xi32>
    %103 = arith.cmpi slt, %5, %102 : vector<1x256xi32>
    %104 = arith.andi %100, %103 : vector<1x256xi1>
    %cst_24 = arith.constant dense<true> : vector<1x256xi1>
    %105 = arith.xori %104, %cst_24 : vector<1x256xi1>
    %106 = arith.andi %97, %105 : vector<1x256xi1>
    %c1_25 = arith.constant 1 : index
    %107 = memref.load %arg3[%c1_25] : memref<2xi32, #tpu.memory_space<smem>>
    %108 = vector.broadcast %107 : i32 to vector<1x256xi32>
    %109 = arith.cmpi sge, %5, %108 : vector<1x256xi32>
    %c1_26 = arith.constant 1 : index
    %110 = memref.load %arg4[%c1_26] : memref<2xi32, #tpu.memory_space<smem>>
    %111 = vector.broadcast %110 : i32 to vector<1x256xi32>
    %112 = arith.cmpi slt, %5, %111 : vector<1x256xi32>
    %113 = arith.andi %109, %112 : vector<1x256xi1>
    %cst_27 = arith.constant dense<true> : vector<1x256xi1>
    %114 = arith.xori %113, %cst_27 : vector<1x256xi1>
    %115 = arith.andi %106, %114 : vector<1x256xi1>
    %116 = vector.broadcast %96 : vector<64x1xi1> to vector<64x256xi1>
    %117 = vector.broadcast %115 : vector<1x256xi1> to vector<64x256xi1>
    %118 = arith.andi %116, %117 : vector<64x256xi1>
    %cst_28 = arith.constant 0.000000e+00 : f32
    %119 = vector.broadcast %cst_28 : f32 to vector<64x256xf32>
    %120 = arith.select %118, %0, %119 : vector<64x256xi1>, vector<64x256xf32>
    %c0_29 = arith.constant 0 : index
    %c0_30 = arith.constant 0 : index
    %121 = vector.load %arg6[%c0_29, %c0_30] : memref<64x256xf32, #tpu.memory_space<vmem>>, vector<64x256xf32>
    tpu.vector_store %arg6[%c0_29, %c0_30], %120 {strides = array<i32>} : memref<64x256xf32, #tpu.memory_space<vmem>>, vector<64x256xf32>,
    return
  }
  func.func @transform_0(%arg0: i32, %arg1: memref<10xi32, #tpu.memory_space<smem>>, %arg2: memref<10xi32, #tpu.memory_space<smem>>, %arg3: memref<2xi32, #tpu.memory_space<smem>>, %arg4: memref<2xi32, #tpu.memory_space<smem>>) -> (i32, i32) {
    %c0_i32 = arith.constant 0 : i32
    %c0_i32_0 = arith.constant 0 : i32
    return %arg0, %c0_i32 : i32, i32
  }
  func.func @transform_1(%arg0: i32, %arg1: memref<10xi32, #tpu.memory_space<smem>>, %arg2: memref<10xi32, #tpu.memory_space<smem>>, %arg3: memref<2xi32, #tpu.memory_space<smem>>, %arg4: memref<2xi32, #tpu.memory_space<smem>>) -> (i32, i32) {
    %c0_i32 = arith.constant 0 : i32
    %c0_i32_0 = arith.constant 0 : i32
    return %arg0, %c0_i32 : i32, i32
  }
}

</mosaic_0001>

<bundles_post_ra>
// kernel: tpu_custom_call.1
= control target key start
LH: loop header
LB: loop body
LE: loop exit
PB: predicated region body
PF: predicated region fallthrough
CT: control target
= control target key end

     0   :  { %s1905_s0 = inlined_call_operand.hbm [shape: s32[10], index: 0, kind: input, shape index: {}]   ;;  %s1906_s4 = inlined_call_operand.hbm [shape: f32[128,256], index: 4, kind: input, shape index: {}]   ;;  %s1907_s5 = inlined_call_operand.hbm [shape: f32[128,256], index: 5, kind: output, shape index: {}]   ;;  %s1908_s1 = inlined_call_operand.vmem [shape: s32[10], index: 1, kind: input, shape index: {}]   ;;  %s1909_s2 = inlined_call_operand.vmem [shape: s32[2], index: 2, kind: input, shape index: {}]   ;;  %s1910_s3 = inlined_call_operand.vmem [shape: s32[2], index: 3, kind: input, shape index: {}]  }
   0x1   :  { %s907_s20 = scalar_lea.hbm %s1905_s0, 16 }
   0x2   :  { %p908_p0 = scmp.ne.s32.totalorder %s1905_s0, %s907_s20  ;;  %p911_p1 = scmp.lt.u32.totalorder %s907_s20, %s1905_s0 }
   0x4   :  { %p913_p2 = pnand %p911_p1, %p908_p0 }
   0x6   :  { %916 = shalt.err (!%p913_p2)  }
   0x7   :  { %s1053_s25 = smov [#allocation3]   ;;  %s12_s30 = sshll.u32 %s1908_s1, 4  ;;  %s13_s30 = int_to_ptr.vmem [resolvable:$true] %s12_s30 }
   0x8   :  { %11 = dma.hbm_to_smem %s1905_s0, 16, %s1053_s25, [#allocation2] }
   0x9   :  { %s16_s8 = sshll.u32 %s1909_s2, 4  ;;  %s917_s9 = scalar_lea.vmem %s13_s30, 16  ;;  %s17_s8 = int_to_ptr.vmem [resolvable:$true] %s16_s8 }
   0xa   :  { %p918_p3 = scmp.ne.s32.totalorder %s13_s30, %s917_s9  ;;  %p922_p4 = scmp.lt.s32.totalorder %s13_s30, %s13_s30 }
   0xb   :  { %p923_p5 = scmp.lt.s32.totalorder %s917_s9, %s917_s9 }
   0xd   :  { %p924_p6 = por %p923_p5, %p922_p4 }
   0xf   :  { %p925_p7 = pnand %p924_p6, %p918_p3 }
  0x11   :  { %928 = shalt.err (!%p925_p7)  }
  0x12   :  { %s1054_s10 = smov [#allocation4]   ;;  %s20_s12 = sshll.u32 %s1910_s3, 4  ;;  %s21_s12 = int_to_ptr.vmem [resolvable:$true] %s20_s12 }
  0x13   :  { %15 = dma.vmem_to_smem %s13_s30, 16, %s1054_s10, [#allocation2] }
  0x14   :  { %s929_s1 = scalar_lea.vmem %s17_s8, 16  ;;  %p934_p9 = scmp.lt.s32.totalorder %s17_s8, %s17_s8 }
  0x15   :  { %p930_p8 = scmp.ne.s32.totalorder %s17_s8, %s929_s1  ;;  %p935_p10 = scmp.lt.s32.totalorder %s929_s1, %s929_s1 }
  0x17   :  { %p936_p11 = por %p935_p10, %p934_p9 }
  0x19   :  { %p937_p12 = pnand %p936_p11, %p930_p8 }
  0x1b   :  { %940 = shalt.err (!%p937_p12)  }
  0x1c   :  { %s1055_s2 = smov [#allocation5]   ;;  %s941_s13 = scalar_lea.vmem %s21_s12, 16 }
  0x1d   :  { %19 = dma.vmem_to_smem %s17_s8, 16, %s1055_s2, [#allocation2] }
  0x1e   :  { %p942_p13 = scmp.ne.s32.totalorder %s21_s12, %s941_s13  ;;  %p946_p0 = scmp.lt.s32.totalorder %s21_s12, %s21_s12 }
  0x1f   :  { %p947_p1 = scmp.lt.s32.totalorder %s941_s13, %s941_s13 }
  0x21   :  { %p948_p2 = por %p947_p1, %p946_p0 }
  0x23   :  { %p949_p3 = pnand %p948_p2, %p942_p13 }
  0x25   :  { %952 = shalt.err (!%p949_p3)  }
  0x26   :  { %s1056_s14 = smov [#allocation6]  }
  0x27   :  { %23 = dma.vmem_to_smem %s21_s12, 16, %s1056_s14, [#allocation2] }
  0x28   :  { %1027 = dma.done.wait [#allocation2], 64 }
  0x29   :  { %1028 = vsyncadd [#allocation2], 4294967232 }
  0x2a   :  { %25 = sfence }
  0x2b   :  { %26 = vsyncpa [#allocation8], 0 }
  0x2c   :  { %28 = vsyncpa [#allocation8 + $0x1], 0 }
  0x2d   :  { %29 = vsyncpa [#allocation9], 0 }
  0x2e   :  { %31 = vsyncpa [#allocation9 + $0x1], 0  ;;  %s1116_s3 = smov 0   ;;  %s1118_s15 = smov 0  }
  0x2f   :  { %s1120_s16 = smov 0   ;;  %s1122_s17 = smov 0  }
  0x30 LB: > { %s1137_s18 = sadd.s32 4294967295, %s1051_s17   ;;  %s810_s19 = sadd.s32 4294967294, %s1051_s17   ;;  %s1051_s17 = sphi %s1122_s17, %s1959_s17   ;;  %s1047_s16 = sphi %s1120_s16, %s1958_s16   ;;  %s1043_s15 = sphi %s1118_s15, %s1957_s15   ;;  %s1039_s3 = sphi %s1116_s3, %s1956_s3  }
  0x31   : > { %s1141_s20 = sadd.s32 1, %s1051_s17   ;;  %s44_s21 = sadd.s32 1, %s1047_s16 }
  0x32   : > { %s41_s22 = ssub.s32 %s1051_s17, %s1141_s20  ;;  %p51_p4 = scmp.ne.s32.totalorder %s1047_s16, %s1043_s15 }
  0x33   : > { %p42_p5 = scmp.eq.s32.totalorder %s41_s22, 0  ;;  %p52_p6 = scmp.eq.s32.totalorder %s1051_s17, 0 }
  0x34   : > { %p57_p7 = scmp.ne.s32.totalorder %s1043_s15, %s1039_s3  ;;  %p58_p8 = scmp.eq.s32.totalorder %s1137_s18, 0 }
  0x35   : > { %s1153_s23 = scalar_select %p42_p5, %s1047_s16, %s44_s21  }
  0x36   : > { %p1155_p9 = por %p52_p6, %p51_p4  ;;  %p1159_p10 = por %p58_p8, %p57_p7 }
  0x37   : > { %p81_p11 = scmp.eq.s32.totalorder %s1137_s18, 1  ;;  %p87_p12 = scmp.eq.s32.totalorder %s810_s19, 1 }
  0x38   : > { %p863_p0 = scmp.lt.s32.totalorder %s1051_s17, 2  ;;  %s107_s28 = sand.u32 1, %s1047_s16  }
  0x39   : > { %p1166_p1 = por %p81_p11, %p51_p4  ;;  %p1170_p2 = por %p87_p12, %p57_p7 }
  0x3a   : > { %s848_s29 = sshll.u32 %s1051_s17, 11  ;;  %s813_s30 = sshll.u32 %s107_s28, 7 }
  0x3b   : > { %s1918_s26 = scalar_select %p1166_p1, 1, 0 }
  0x3c   : > { %s1919_s27 = scalar_select %p1170_p2, 1, 0 }
  0x3d   : > { %s1179_s8 = scalar_lea.hbm %s1906_s4, %s848_s29  ;;  %s111_s9 = scalar_lea.vmem [#allocation7], %s813_s30 }
  0x3e   : > { %s119_s10 = sshll.u32 %s111_s9, 4  ;;  %p1183_p3 = pnand %p863_p0, %p1155_p9  ;;  %s1187_s10 = int_to_ptr.vmem [resolvable:$true] %s119_s10 }
  0x3f   : > { %s1189_s11 = scalar_lea.sflag [#allocation8], %s107_s28  ;;  %s953_s12 = scalar_lea.hbm %s1179_s8, 2048 }
  0x40   : > { %p954_p4 = scmp.ne.s32.totalorder %s1179_s8, %s953_s12  ;;  %p955_p5 = pneg %p1183_p3 }
  0x41   : > { %s958_s13 = scalar_lea.hbm %s1906_s4, 4096  ;;  %p959_p8 = scmp.lt.u32.totalorder %s1179_s8, %s1906_s4 }
  0x42   : > { %p956_p6 = pnand %p955_p5, %p954_p4  ;;  %p960_p9 = scmp.lt.u32.totalorder %s958_s13, %s953_s12 }
  0x43   : > { %p962_p12 = scmp.lt.u32.totalorder %s953_s12, %s1179_s8 }
  0x44   : > { %p957_p7 = pneg %p956_p6  ;;  %p961_p11 = por %p960_p9, %p959_p8 }
  0x46   : > { %p963_p0 = por %p962_p12, %p961_p11 }
  0x48   : > { %p964_p13 = pnand %p963_p0, %p957_p7 }
  0x4a   : > { %967 = shalt.err (!%p964_p13)
}
  0x4b   : > { %s968_s21 = scalar_lea.vmem %s1187_s10, 2048  ;;  %s1057_s22 = smov [#allocation7]  }
  0x4c   : > { %p969_p4 = scmp.ne.s32.totalorder %s1187_s10, %s968_s21  ;;  %s973_s24 = sshll.u32 %s1057_s22, 4  ;;  %s974_s24 = int_to_ptr.vmem [resolvable:$false] %s973_s24 }
  0x4d   : > { %s975_s28 = scalar_lea.vmem %s974_s24, 4096  ;;  %p976_p1 = scmp.lt.s32.totalorder %s1187_s10, %s974_s24 }
  0x4e   : > { %p971_p6 = pnand %p969_p4, %p955_p5  ;;  %p977_p8 = scmp.lt.s32.totalorder %s975_s28, %s968_s21 }
  0x50   : > { %p972_p2 = pneg %p971_p6  ;;  %p978_p9 = por %p977_p8, %p976_p1 }
  0x52   : > { %p979_p11 = pnand %p978_p9, %p972_p2 }
  0x54   : > { %982 = shalt.err (!%p979_p11)
}
  0x55   : > { %s1058_s29 = smov 256   ;;  %s1059_s30 = smov 16  }
  0x56   : > { %858 = dma.hbm_to_vmem [thread:$0]  (!%p1183_p3), %s1179_s8, 2048, %s1187_s10, %s1189_s11, %s1058_s29, %s1058_s29, %s1059_s30  }
  0x57   : > { %p817_p13 = scmp.ge.s32.totalorder %s1051_s17, 1  ;;  %p127_p5 = scmp.lt.s32.totalorder %s1051_s17, 3 }
  0x59   : > { %p128_p7 = pnand %p817_p13, %p127_p5 }
  0x5a   : > { %s1220_s6 = sand.u32 (!%p128_p7), 1, %s1043_s15  }
  0x5b   : > { %131 = sbr.rel (%p128_p7) target bundleno = 384 (0x180), region = 24  ;;  %s818_s7 = sshll.u32 (!%p128_p7), %s1220_s6, 7 }
  0x5c   : > { %s134_s9 = scalar_lea.sflag (!%p128_p7), [#allocation8], %s1220_s6  ;;  %s1226_s12 = scalar_lea.vmem (!%p128_p7), [#allocation7], %s818_s7 }
  0x62   : > { %1030 = dma.done.wait (%p1159_p10), %s134_s9, 2048  }
  0x63   : > { %1032 = vsyncadd (%p1159_p10), %s134_s9, 4294965248  ;;  %s820_s8 = sshll.u32 %s1137_s18, 6  ;;  %v175_v0 = vlaneseq  ;;  %s196_s10 = sld [smem:[#allocation3]]  ;;  %vm1060_vm5 = vmmov 1   ;;  %v1061_v46 = vmov 0   ;;  %v158_v49 = vld [vmem:[%s1226_s12] sm:$0xff] }
  0x64   : > { %s206_s0 = sld [smem:[#allocation4]]  ;;  %v1236_v2 = vstv %s820_s8  ;;  %s821_s11 = sld [smem:[#allocation3 + $0x1]]  ;;  %v1929_v50 = vmov 0  ;;  %v159_v53 = vld [vmem:[%s1226_s12 + $0x8] sm:$0xff]  ;;  %v1931_v54 = vmov 0  ;;  %v160_v56 = vld [vmem:[%s1226_s12 + $0x10] sm:$0xff] }
  0x65   : > { %v1234_v1 = vshrl.u32 %v175_v0, 7  ;;  %s822_s1 = sld [smem:[#allocation4 + $0x1]]  ;;  %s823_s2 = sld [smem:[#allocation3 + $0x2]]  ;;  %v194_v42 = vand.u32 127, %v175_v0  ;;  %v161_v58 = vld [vmem:[%s1226_s12 + $0x18] sm:$0xff]  ;;  %v162_v62 = vld [vmem:[%s1226_s12 + $0x20] sm:$0xff] }
  0x66   : > { %s824_s13 = sld [smem:[#allocation4 + $0x2]]  ;;  %s1241_s25 = sld [smem:[#allocation3 + $0x3]]  ;;  %v163_v0 = vld [vmem:[%s1226_s12 + $0x28] sm:$0xff]  ;;  %v168_v37 = vld [vmem:[%s1226_s12 + $0x50] sm:$0xff] }
  0x67   : > { %v178_v3 = vadd.s32 16, %v1234_v1  ;;  %v179_v4 = vadd.s32 24, %v1234_v1  ;;  %v180_v5 = vadd.s32 32, %v1234_v1  ;;  %v181_v6 = vadd.s32 40, %v1234_v1  ;;  %s826_s14 = sld [smem:[#allocation4 + $0x3]]  ;;  %s827_s19 = sld [smem:[#allocation3 + $0x4]] }
  0x68   : > { %v182_v7 = vadd.s32 48, %v1234_v1  ;;  %v183_v8 = vadd.s32 56, %v1234_v1  ;;  %v1248_v9 = vadd.s32 %v1236_v2, %v1234_v1  ;;  %s828_s21 = sld [smem:[#allocation4 + $0x4]]  ;;  %s829_s22 = sld [smem:[#allocation3 + $0x5]]  ;;  %v195_v45 = vadd.s32 128, %v194_v42 }
  0x69   : > { %v1251_v10 = vadd.s32 %v1236_v2, %v178_v3  ;;  %v1254_v11 = vadd.s32 %v1236_v2, %v179_v4  ;;  %v1257_v12 = vadd.s32 %v1236_v2, %v180_v5  ;;  %v1260_v13 = vadd.s32 %v1236_v2, %v181_v6  ;;  %s830_s24 = sld [smem:[#allocation4 + $0x5]]  ;;  %s831_s28 = sld [smem:[#allocation3 + $0x6]]  ;;  %v164_v4 = vld [vmem:[%s1226_s12 + $0x30] sm:$0xff]  ;;  %v165_v6 = vld [vmem:[%s1226_s12 + $0x38] sm:$0xff] }
  0x6a   : > { %v1263_v14 = vadd.s32 %v1236_v2, %v182_v7  ;;  %v1266_v15 = vadd.s32 %v1236_v2, %v183_v8  ;;  %v1268_v16 = vstv %s196_s10  ;;  %v1272_v17 = vstv %s206_s0  ;;  %s832_s29 = sld [smem:[#allocation4 + $0x6]]  ;;  %s833_s30 = sld [smem:[#allocation3 + $0x7]] }
  0x6b   : > { %vm198_vm0 = vcmp.ge.s32.totalorder %v1248_v9, %v1268_v16  ;;  %v1274_v18 = vstv %s821_s11  ;;  %v1276_v19 = vstv %s822_s1  ;;  %vm208_vm1 = vcmp.lt.s32.totalorder %v1248_v9, %v1272_v17  ;;  %s834_s9 = sld [smem:[#allocation4 + $0x7]]  ;;  %s835_s8 = sld [smem:[#allocation3 + $0x8]] }
  0x6c   : > { %vm234_vm2 = vcmp.ge.s32.totalorder %v1248_v9, %v1274_v18  ;;  %vm244_vm3 = vcmp.lt.s32.totalorder %v1248_v9, %v1276_v19  ;;  %v1284_v20 = vstv %s823_s2  ;;  %vm216_vm4 = vmand %vm198_vm0, %vm208_vm1  ;;  %v1286_v21 = vstv %s824_s13  ;;  %s836_s10 = sld [smem:[#allocation4 + $0x8]]  ;;  %s837_s0 = sld [smem:[#allocation3 + $0x9]] }
  0x6d   : > { %vm1289_vm6 = vmxor %vm216_vm4, %vm1060_vm5  ;;  %vm278_vm8 = vcmp.ge.s32.totalorder %v1248_v9, %v1284_v20  ;;  %vm288_vm9 = vcmp.lt.s32.totalorder %v1248_v9, %v1286_v21  ;;  %v1298_v23 = vstv %s1241_s25  ;;  %v1300_v24 = vstv %s826_s14  ;;  %s838_s11 = sld [smem:[#allocation4 + $0x9]]  ;;  %s1351_s1 = sld [smem:[#allocation5]] }
  0x6e   : > { %vm252_vm7 = vmand %vm234_vm2, %vm244_vm3  ;;  %vm322_vm13 = vcmp.ge.s32.totalorder %v1248_v9, %v1298_v23  ;;  %vm332_vm14 = vcmp.lt.s32.totalorder %v1248_v9, %v1300_v24  ;;  %v1309_v25 = vstv %s827_s19  ;;  %v1311_v26 = vstv %s828_s21  ;;  %s1353_s2 = sld [smem:[#allocation6]]  ;;  %s1365_s13 = sld [smem:[#allocation5 + $0x1]] }
  0x6f   : > { %vm260_vm10 = vmxor %vm252_vm7, %vm1060_vm5  ;;  %vm366_vm2 = vcmp.ge.s32.totalorder %v1248_v9, %v1309_v25  ;;  %vm376_vm3 = vcmp.lt.s32.totalorder %v1248_v9, %v1311_v26  ;;  %v1322_v28 = vstv %s829_s22  ;;  %v1324_v29 = vstv %s830_s24  ;;  %s1367_s25 = sld [smem:[#allocation6 + $0x1]]  ;;  %s1411_s14 = scalar_lea.vmem [#allocation10], %s818_s7 }
  0x70   : > { %vm268_vm11 = vmand %vm1289_vm6, %vm260_vm10  ;;  %v1333_v30 = vstv %s831_s28  ;;  %v1335_v31 = vstv %s832_s29  ;;  %v1346_v33 = vstv %s833_s30  ;;  %v177_v48 = vadd.s32 8, %v1234_v1  ;;  %s850_s7 = sshll.u32 %s1137_s18, 11  ;;  %s737_s19 = sshll.u32 %s1411_s14, 4  ;;  %s1857_s19 = int_to_ptr.vmem [resolvable:$true] %s737_s19 }
  0x71   : > { %vm296_vm12 = vmand %vm278_vm8, %vm288_vm9  ;;  %vm410_vm8 = vcmp.ge.s32.totalorder %v1248_v9, %v1322_v28  ;;  %vm420_vm9 = vcmp.lt.s32.totalorder %v1248_v9, %v1324_v29  ;;  %v1348_v34 = vstv %s834_s9  ;;  %v1361_v35 = vstv %s835_s8  ;;  %s1855_s24 = scalar_lea.hbm %s1907_s5, %s850_s7  ;;  %s723_s18 = scalar_lea.sflag [#allocation9], %s1220_s6 }
  0x72   : > { %vm304_vm15 = vmxor %vm296_vm12, %vm1060_vm5  ;;  %v1363_v36 = vstv %s836_s10  ;;  %v1378_v38 = vstv %s837_s0  ;;  %v186_v51 = vadd.s32 %v1236_v2, %v177_v48  ;;  %p1953_p1 = scmp.ne.s32.totalorder %s1918_s26, 0  ;;  %s1062_s28 = smov [#allocation10]  }
  0x73   : > { %vm1314_vm0 = vmand %vm268_vm11, %vm304_vm15  ;;  %v1380_v39 = vstv %s838_s11  ;;  %v629_v40 = vstv %s1351_s1  ;;  %s987_s29 = sshll.u32 %s1062_s28, 4  ;;  %s988_s29 = int_to_ptr.vmem [resolvable:$false] %s987_s29 }
  0x74   : > { %vm340_vm1 = vmand %vm322_vm13, %vm332_vm14  ;;  %vm454_vm13 = vcmp.ge.s32.totalorder %v1248_v9, %v1333_v30  ;;  %vm464_vm14 = vcmp.lt.s32.totalorder %v1248_v9, %v1335_v31  ;;  %v633_v41 = vstv %s1353_s2  ;;  %v641_v43 = vstv %s1365_s13  ;;  %s989_s30 = scalar_lea.vmem %s988_s29, 4096  ;;  %p990_p12 = scmp.lt.s32.totalorder %s1857_s19, %s988_s29 }
  0x75   : > { %vm348_vm4 = vmxor %vm340_vm1, %vm1060_vm5  ;;  %v645_v44 = vstv %s1367_s25 }
  0x76   : > { %vm356_vm6 = vmand %vm1314_vm0, %vm348_vm4 }
  0x77   : > { %vm384_vm7 = vmand %vm366_vm2, %vm376_vm3  ;;  %vm498_vm2 = vcmp.ge.s32.totalorder %v1248_v9, %v1346_v33  ;;  %vm508_vm3 = vcmp.lt.s32.totalorder %v1248_v9, %v1348_v34 }
  0x78   : > { %vm392_vm10 = vmxor %vm384_vm7, %vm1060_vm5 }
  0x79   : > { %vm1338_vm11 = vmand %vm356_vm6, %vm392_vm10 }
  0x7a   : > { %vm428_vm12 = vmand %vm410_vm8, %vm420_vm9  ;;  %vm542_vm8 = vcmp.ge.s32.totalorder %v1248_v9, %v1361_v35  ;;  %vm552_vm9 = vcmp.lt.s32.totalorder %v1248_v9, %v1363_v36 }
  0x7b   : > { %vm436_vm15 = vmxor %vm428_vm12, %vm1060_vm5 }
  0x7c   : > { %vm444_vm0 = vmand %vm1338_vm11, %vm436_vm15 }
  0x7d   : > { %vm472_vm1 = vmand %vm454_vm13, %vm464_vm14  ;;  %vm586_vm13 = vcmp.ge.s32.totalorder %v1248_v9, %v1378_v38  ;;  %vm596_vm14 = vcmp.lt.s32.totalorder %v1248_v9, %v1380_v39 }
  0x7e   : > { %vm480_vm4 = vmxor %vm472_vm1, %vm1060_vm5 }
  0x7f   : > { %vm1370_vm6 = vmand %vm444_vm0, %vm480_vm4 }
  0x80   : > { %vm516_vm7 = vmand %vm498_vm2, %vm508_vm3  ;;  %vm630_vm2 = vcmp.ge.s32.totalorder %v194_v42, %v629_v40  ;;  %vm634_vm3 = vcmp.lt.s32.totalorder %v194_v42, %v633_v41 }
  0x81   : > { %vm524_vm10 = vmxor %vm516_vm7, %vm1060_vm5  ;;  %vm642_vm7 = vcmp.ge.s32.totalorder %v194_v42, %v641_v43 }
  0x82   : > { %vm532_vm11 = vmand %vm1370_vm6, %vm524_vm10 }
  0x83   : > { %vm560_vm12 = vmand %vm542_vm8, %vm552_vm9  ;;  %vm646_vm8 = vcmp.lt.s32.totalorder %v194_v42, %v645_v44 }
  0x84   : > { %vm568_vm15 = vmxor %vm560_vm12, %vm1060_vm5 }
  0x85   : > { %vm576_vm0 = vmand %vm532_vm11, %vm568_vm15  ;;  %vm635_vm15 = vcmp.lt.s32.totalorder %v195_v45, %v633_v41 }
  0x86   : > { %vm604_vm1 = vmand %vm586_vm13, %vm596_vm14  ;;  %vm631_vm14 = vcmp.ge.s32.totalorder %v195_v45, %v629_v40 }
  0x87   : > { %vm612_vm4 = vmxor %vm604_vm1, %vm1060_vm5 }
  0x88   : > { %vm620_vm6 = vmand %vm576_vm0, %vm612_vm4 }
  0x89   : > { %vm636_vm9 = vmand %vm630_vm2, %vm634_vm3  ;;  %v654_v47 = vsel %vm620_vm6, 1, %v1061_v46  ;;  %vm643_vm2 = vcmp.ge.s32.totalorder %v195_v45, %v641_v43  ;;  %vm647_vm3 = vcmp.lt.s32.totalorder %v195_v45, %v645_v44  ;;  %v170_v44 = vld [vmem:[%s1226_s12 + $0x60] sm:$0xff] }
  0x8a   : > { %vm638_vm10 = vmxor %vm636_vm9, %vm1060_vm5  ;;  %vm662_vm12 = vcmp.eq.s32.totalorder %v654_v47, 1  ;;  %vm199_vm9 = vcmp.ge.s32.totalorder %v186_v51, %v1268_v16 }
  0x8b   : > { %vm648_vm11 = vmand %vm642_vm7, %vm646_vm8 }
  0x8c   : > { %vm650_vm13 = vmxor %vm648_vm11, %vm1060_vm5 }
  0x8d   : > { %vm1401_vm0 = vmand %vm638_vm10, %vm650_vm13  ;;  %vm209_vm10 = vcmp.lt.s32.totalorder %v186_v51, %v1272_v17 }
  0x8e   : > { %v1930_v50 = vsel %vm1401_vm0, 4294967295, %v1929_v50  ;;  %vm674_vm1 = vmand %vm662_vm12, %vm1401_vm0 }
  0x8f   : > { %v690_v52 = vsel %vm674_vm1, %v158_v49, 0.0  ;;  %vm637_vm4 = vmand %vm631_vm14, %vm635_vm15  ;;  %vm235_vm14 = vcmp.ge.s32.totalorder %v186_v51, %v1274_v18  ;;  %vm245_vm15 = vcmp.lt.s32.totalorder %v186_v51, %v1276_v19 }
  0x90   : > { %706 = vst [vmem:[%s1411_s14] sm:$0xff] %v690_v52  ;;  %vm639_vm6 = vmxor %vm637_vm4, %vm1060_vm5  ;;  %vm279_vm4 = vcmp.ge.s32.totalorder %v186_v51, %v1284_v20 }
  0x91   : > { %vm649_vm7 = vmand %vm643_vm2, %vm647_vm3 }
  0x92   : > { %vm651_vm8 = vmxor %vm649_vm7, %vm1060_vm5 }
  0x93   : > { %vm1419_vm11 = vmand %vm639_vm6, %vm651_vm8  ;;  %vm289_vm6 = vcmp.lt.s32.totalorder %v186_v51, %v1286_v21 }
  0x94   : > { %v1932_v54 = vsel %vm1419_vm11, 4294967295, %v1931_v54  ;;  %vm675_vm13 = vmand %vm662_vm12, %vm1419_vm11  ;;  %vm323_vm12 = vcmp.ge.s32.totalorder %v186_v51, %v1298_v23  ;;  %vm333_vm11 = vcmp.lt.s32.totalorder %v186_v51, %v1300_v24 }
  0x95   : > { %v691_v55 = vsel %vm675_vm13, %v159_v53, 0.0  ;;  %vm217_vm1 = vmand %vm199_vm9, %vm209_vm10 }
  0x96   : > { %707 = vst [vmem:[%s1411_s14 + $0x8] sm:$0xff] %v691_v55  ;;  %vm225_vm2 = vmxor %vm217_vm1, %vm1060_vm5  ;;  %vm367_vm1 = vcmp.ge.s32.totalorder %v186_v51, %v1309_v25 }
  0x97   : > { %vm253_vm3 = vmand %vm235_vm14, %vm245_vm15  ;;  %vm377_vm14 = vcmp.lt.s32.totalorder %v186_v51, %v1311_v26 }
  0x98   : > { %vm261_vm7 = vmxor %vm253_vm3, %vm1060_vm5 }
  0x99   : > { %vm269_vm8 = vmand %vm225_vm2, %vm261_vm7  ;;  %vm411_vm7 = vcmp.ge.s32.totalorder %v186_v51, %v1322_v28 }
  0x9a   : > { %vm297_vm0 = vmand %vm279_vm4, %vm289_vm6  ;;  %vm421_vm4 = vcmp.lt.s32.totalorder %v186_v51, %v1324_v29 }
  0x9b   : > { %vm305_vm13 = vmxor %vm297_vm0, %vm1060_vm5 }
  0x9c   : > { %vm313_vm9 = vmand %vm269_vm8, %vm305_vm13  ;;  %vm455_vm13 = vcmp.ge.s32.totalorder %v186_v51, %v1333_v30 }
  0x9d   : > { %vm341_vm10 = vmand %vm323_vm12, %vm333_vm11  ;;  %vm465_vm11 = vcmp.lt.s32.totalorder %v186_v51, %v1335_v31 }
  0x9e   : > { %vm349_vm15 = vmxor %vm341_vm10, %vm1060_vm5 }
  0x9f   : > { %vm357_vm3 = vmand %vm313_vm9, %vm349_vm15  ;;  %vm499_vm15 = vcmp.ge.s32.totalorder %v186_v51, %v1346_v33 }
  0xa0   : > { %vm385_vm2 = vmand %vm367_vm1, %vm377_vm14  ;;  %vm509_vm1 = vcmp.lt.s32.totalorder %v186_v51, %v1348_v34 }
  0xa1   : > { %vm393_vm6 = vmxor %vm385_vm2, %vm1060_vm5 }
  0xa2   : > { %vm401_vm0 = vmand %vm357_vm3, %vm393_vm6  ;;  %vm543_vm6 = vcmp.ge.s32.totalorder %v186_v51, %v1361_v35 }
  0xa3   : > { %vm429_vm8 = vmand %vm411_vm7, %vm421_vm4  ;;  %vm553_vm7 = vcmp.lt.s32.totalorder %v186_v51, %v1363_v36 }
  0xa4   : > { %vm437_vm12 = vmxor %vm429_vm8, %vm1060_vm5 }
  0xa5   : > { %vm445_vm10 = vmand %vm401_vm0, %vm437_vm12 }
  0xa6   : > { %vm473_vm9 = vmand %vm455_vm13, %vm465_vm11  ;;  %vm587_vm13 = vcmp.ge.s32.totalorder %v186_v51, %v1378_v38  ;;  %vm597_vm11 = vcmp.lt.s32.totalorder %v186_v51, %v1380_v39 }
  0xa7   : > { %vm481_vm14 = vmxor %vm473_vm9, %vm1060_vm5 }
  0xa8   : > { %vm489_vm2 = vmand %vm445_vm10, %vm481_vm14 }
  0xa9   : > { %vm517_vm3 = vmand %vm499_vm15, %vm509_vm1  ;;  %vm200_vm15 = vcmp.ge.s32.totalorder %v1251_v10, %v1268_v16  ;;  %vm210_vm1 = vcmp.lt.s32.totalorder %v1251_v10, %v1272_v17 }
  0xaa   : > { %vm525_vm4 = vmxor %vm517_vm3, %vm1060_vm5 }
  0xab   : > { %vm533_vm8 = vmand %vm489_vm2, %vm525_vm4  ;;  %vm236_vm4 = vcmp.ge.s32.totalorder %v1251_v10, %v1274_v18 }
  0xac   : > { %vm561_vm0 = vmand %vm543_vm6, %vm553_vm7 }
  0xad   : > { %vm569_vm12 = vmxor %vm561_vm0, %vm1060_vm5  ;;  %vm1935_vm0 = vnez %v1930_v50 }
  0xae   : > { %vm577_vm9 = vmand %vm533_vm8, %vm569_vm12  ;;  %vm246_vm8 = vcmp.lt.s32.totalorder %v1251_v10, %v1276_v19 }
  0xaf   : > { %vm605_vm10 = vmand %vm587_vm13, %vm597_vm11  ;;  %vm1936_vm11 = vnez %v1932_v54 }
  0xb0   : > { %vm613_vm14 = vmxor %vm605_vm10, %vm1060_vm5  ;;  %vm280_vm10 = vcmp.ge.s32.totalorder %v1251_v10, %v1284_v20 }
  0xb1   : > { %vm621_vm3 = vmand %vm577_vm9, %vm613_vm14 }
  0xb2   : > { %v655_v57 = vsel %vm621_vm3, 1, %v1061_v46  ;;  %vm218_vm2 = vmand %vm200_vm15, %vm210_vm1  ;;  %vm290_vm15 = vcmp.lt.s32.totalorder %v1251_v10, %v1286_v21 }
  0xb3   : > { %vm663_vm6 = vcmp.eq.s32.totalorder %v655_v57, 1  ;;  %vm1463_vm7 = vmxor %vm218_vm2, %vm1060_vm5  ;;  %vm324_vm2 = vcmp.ge.s32.totalorder %v1251_v10, %v1298_v23 }
  0xb4   : > { %vm676_vm13 = vmand %vm663_vm6, %vm1935_vm0 }
  0xb5   : > { %v692_v60 = vsel %vm676_vm13, %v160_v56, 0.0  ;;  %vm677_vm12 = vmand %vm663_vm6, %vm1936_vm11  ;;  %vm334_vm6 = vcmp.lt.s32.totalorder %v1251_v10, %v1300_v24 }
  0xb6   : > { %708 = vst [vmem:[%s1411_s14 + $0x10] sm:$0xff] %v692_v60  ;;  %v693_v61 = vsel %vm677_vm12, %v161_v58, 0.0  ;;  %vm254_vm9 = vmand %vm236_vm4, %vm246_vm8  ;;  %vm368_vm12 = vcmp.ge.s32.totalorder %v1251_v10, %v1309_v25 }
  0xb7   : > { %709 = vst [vmem:[%s1411_s14 + $0x18] sm:$0xff] %v693_v61  ;;  %vm262_vm1 = vmxor %vm254_vm9, %vm1060_vm5  ;;  %vm378_vm9 = vcmp.lt.s32.totalorder %v1251_v10, %v1311_v26 }
  0xb8   : > { %vm270_vm14 = vmand %vm1463_vm7, %vm262_vm1  ;;  %vm422_vm1 = vcmp.lt.s32.totalorder %v1251_v10, %v1324_v29 }
  0xb9   : > { %vm298_vm3 = vmand %vm280_vm10, %vm290_vm15  ;;  %vm412_vm15 = vcmp.ge.s32.totalorder %v1251_v10, %v1322_v28 }
  0xba   : > { %vm306_vm4 = vmxor %vm298_vm3, %vm1060_vm5 }
  0xbb   : > { %vm314_vm8 = vmand %vm270_vm14, %vm306_vm4  ;;  %vm466_vm4 = vcmp.lt.s32.totalorder %v1251_v10, %v1335_v31 }
  0xbc   : > { %vm342_vm13 = vmand %vm324_vm2, %vm334_vm6  ;;  %vm456_vm6 = vcmp.ge.s32.totalorder %v1251_v10, %v1333_v30 }
  0xbd   : > { %vm350_vm11 = vmxor %vm342_vm13, %vm1060_vm5 }
  0xbe   : > { %vm358_vm7 = vmand %vm314_vm8, %vm350_vm11 }
  0xbf   : > { %vm386_vm10 = vmand %vm368_vm12, %vm378_vm9  ;;  %vm500_vm12 = vcmp.ge.s32.totalorder %v1251_v10, %v1346_v33  ;;  %vm510_vm9 = vcmp.lt.s32.totalorder %v1251_v10, %v1348_v34 }
  0xc0   : > { %vm394_vm3 = vmxor %vm386_vm10, %vm1060_vm5 }
  0xc1   : > { %vm402_vm14 = vmand %vm358_vm7, %vm394_vm3  ;;  %vm554_vm3 = vcmp.lt.s32.totalorder %v1251_v10, %v1363_v36 }
  0xc2   : > { %vm430_vm2 = vmand %vm412_vm15, %vm422_vm1  ;;  %vm544_vm1 = vcmp.ge.s32.totalorder %v1251_v10, %v1361_v35 }
  0xc3   : > { %vm438_vm13 = vmxor %vm430_vm2, %vm1060_vm5 }
  0xc4   : > { %vm446_vm11 = vmand %vm402_vm14, %vm438_vm13  ;;  %vm598_vm13 = vcmp.lt.s32.totalorder %v1251_v10, %v1380_v39 }
  0xc5   : > { %vm474_vm8 = vmand %vm456_vm6, %vm466_vm4  ;;  %vm588_vm4 = vcmp.ge.s32.totalorder %v1251_v10, %v1378_v38  ;;  %v166_v10 = vld [vmem:[%s1226_s12 + $0x40] sm:$0xff] }
  0xc6   : > { %vm482_vm10 = vmxor %vm474_vm8, %vm1060_vm5 }
  0xc7   : > { %vm490_vm7 = vmand %vm446_vm11, %vm482_vm10  ;;  %vm211_vm10 = vcmp.lt.s32.totalorder %v1254_v11, %v1272_v17 }
  0xc8   : > { %vm518_vm15 = vmand %vm500_vm12, %vm510_vm9  ;;  %vm201_vm9 = vcmp.ge.s32.totalorder %v1254_v11, %v1268_v16 }
  0xc9   : > { %vm526_vm14 = vmxor %vm518_vm15, %vm1060_vm5 }
  0xca   : > { %vm534_vm2 = vmand %vm490_vm7, %vm526_vm14 }
  0xcb   : > { %vm562_vm6 = vmand %vm544_vm1, %vm554_vm3 }
  0xcc   : > { %vm570_vm11 = vmxor %vm562_vm6, %vm1060_vm5  ;;  %vm247_vm6 = vcmp.lt.s32.totalorder %v1254_v11, %v1276_v19 }
  0xcd   : > { %vm578_vm8 = vmand %vm534_vm2, %vm570_vm11  ;;  %vm237_vm2 = vcmp.ge.s32.totalorder %v1254_v11, %v1274_v18 }
  0xce   : > { %vm606_vm12 = vmand %vm588_vm4, %vm598_vm13  ;;  %vm1939_vm13 = vnez %v1932_v54 }
  0xcf   : > { %vm614_vm7 = vmxor %vm606_vm12, %vm1060_vm5  ;;  %vm281_vm12 = vcmp.ge.s32.totalorder %v1254_v11, %v1284_v20 }
  0xd0   : > { %vm622_vm15 = vmand %vm578_vm8, %vm614_vm7 }
  0xd1   : > { %v656_v63 = vsel %vm622_vm15, 1, %v1061_v46  ;;  %vm219_vm1 = vmand %vm201_vm9, %vm211_vm10  ;;  %vm291_vm9 = vcmp.lt.s32.totalorder %v1254_v11, %v1286_v21 }
  0xd2   : > { %vm664_vm3 = vcmp.eq.s32.totalorder %v656_v63, 1  ;;  %vm1528_vm14 = vmxor %vm219_vm1, %vm1060_vm5  ;;  %vm325_vm1 = vcmp.ge.s32.totalorder %v1254_v11, %v1298_v23 }
  0xd3   : > { %vm678_vm4 = vmand %vm664_vm3, %vm1935_vm0 }
  0xd4   : > { %v694_v2 = vsel %vm678_vm4, %v162_v62, 0.0  ;;  %vm679_vm11 = vmand %vm664_vm3, %vm1939_vm13  ;;  %vm335_vm3 = vcmp.lt.s32.totalorder %v1254_v11, %v1300_v24 }
  0xd5   : > { %710 = vst [vmem:[%s1411_s14 + $0x20] sm:$0xff] %v694_v2  ;;  %v695_v3 = vsel %vm679_vm11, %v163_v0, 0.0  ;;  %vm255_vm8 = vmand %vm237_vm2, %vm247_vm6  ;;  %vm369_vm11 = vcmp.ge.s32.totalorder %v1254_v11, %v1309_v25 }
  0xd6   : > { %711 = vst [vmem:[%s1411_s14 + $0x28] sm:$0xff] %v695_v3  ;;  %vm263_vm10 = vmxor %vm255_vm8, %vm1060_vm5  ;;  %vm379_vm8 = vcmp.lt.s32.totalorder %v1254_v11, %v1311_v26 }
  0xd7   : > { %vm271_vm7 = vmand %vm1528_vm14, %vm263_vm10  ;;  %vm423_vm10 = vcmp.lt.s32.totalorder %v1254_v11, %v1324_v29 }
  0xd8   : > { %vm299_vm15 = vmand %vm281_vm12, %vm291_vm9  ;;  %vm413_vm9 = vcmp.ge.s32.totalorder %v1254_v11, %v1322_v28 }
  0xd9   : > { %vm307_vm2 = vmxor %vm299_vm15, %vm1060_vm5 }
  0xda   : > { %vm315_vm6 = vmand %vm271_vm7, %vm307_vm2  ;;  %vm467_vm2 = vcmp.lt.s32.totalorder %v1254_v11, %v1335_v31 }
  0xdb   : > { %vm343_vm4 = vmand %vm325_vm1, %vm335_vm3  ;;  %vm457_vm3 = vcmp.ge.s32.totalorder %v1254_v11, %v1333_v30 }
  0xdc   : > { %vm351_vm13 = vmxor %vm343_vm4, %vm1060_vm5 }
  0xdd   : > { %vm359_vm14 = vmand %vm315_vm6, %vm351_vm13 }
  0xde   : > { %vm387_vm12 = vmand %vm369_vm11, %vm379_vm8  ;;  %vm501_vm11 = vcmp.ge.s32.totalorder %v1254_v11, %v1346_v33  ;;  %vm511_vm8 = vcmp.lt.s32.totalorder %v1254_v11, %v1348_v34 }
  0xdf   : > { %vm395_vm15 = vmxor %vm387_vm12, %vm1060_vm5 }
  0xe0   : > { %vm403_vm7 = vmand %vm359_vm14, %vm395_vm15  ;;  %vm555_vm15 = vcmp.lt.s32.totalorder %v1254_v11, %v1363_v36 }
  0xe1   : > { %vm431_vm1 = vmand %vm413_vm9, %vm423_vm10  ;;  %vm545_vm10 = vcmp.ge.s32.totalorder %v1254_v11, %v1361_v35 }
  0xe2   : > { %vm439_vm4 = vmxor %vm431_vm1, %vm1060_vm5 }
  0xe3   : > { %vm447_vm13 = vmand %vm403_vm7, %vm439_vm4  ;;  %vm599_vm4 = vcmp.lt.s32.totalorder %v1254_v11, %v1380_v39 }
  0xe4   : > { %vm475_vm6 = vmand %vm457_vm3, %vm467_vm2  ;;  %vm589_vm2 = vcmp.ge.s32.totalorder %v1254_v11, %v1378_v38 }
  0xe5   : > { %vm483_vm12 = vmxor %vm475_vm6, %vm1060_vm5 }
  0xe6   : > { %vm491_vm14 = vmand %vm447_vm13, %vm483_vm12  ;;  %vm212_vm12 = vcmp.lt.s32.totalorder %v1257_v12, %v1272_v17 }
  0xe7   : > { %vm519_vm9 = vmand %vm501_vm11, %vm511_vm8  ;;  %vm202_vm8 = vcmp.ge.s32.totalorder %v1257_v12, %v1268_v16 }
  0xe8   : > { %vm527_vm7 = vmxor %vm519_vm9, %vm1060_vm5 }
  0xe9   : > { %vm535_vm1 = vmand %vm491_vm14, %vm527_vm7 }
  0xea   : > { %vm563_vm3 = vmand %vm545_vm10, %vm555_vm15 }
  0xeb   : > { %vm571_vm13 = vmxor %vm563_vm3, %vm1060_vm5  ;;  %vm248_vm3 = vcmp.lt.s32.totalorder %v1257_v12, %v1276_v19 }
  0xec   : > { %vm579_vm6 = vmand %vm535_vm1, %vm571_vm13  ;;  %vm238_vm1 = vcmp.ge.s32.totalorder %v1257_v12, %v1274_v18 }
  0xed   : > { %vm607_vm11 = vmand %vm589_vm2, %vm599_vm4  ;;  %vm1942_vm4 = vnez %v1932_v54 }
  0xee   : > { %vm615_vm14 = vmxor %vm607_vm11, %vm1060_vm5  ;;  %vm282_vm11 = vcmp.ge.s32.totalorder %v1257_v12, %v1284_v20 }
  0xef   : > { %vm623_vm9 = vmand %vm579_vm6, %vm615_vm14 }
  0xf0   : > { %v657_v5 = vsel %vm623_vm9, 1, %v1061_v46  ;;  %vm220_vm10 = vmand %vm202_vm8, %vm212_vm12  ;;  %vm292_vm8 = vcmp.lt.s32.totalorder %v1257_v12, %v1286_v21 }
  0xf1   : > { %vm665_vm15 = vcmp.eq.s32.totalorder %v657_v5, 1  ;;  %vm1593_vm7 = vmxor %vm220_vm10, %vm1060_vm5  ;;  %vm326_vm10 = vcmp.ge.s32.totalorder %v1257_v12, %v1298_v23 }
  0xf2   : > { %vm680_vm2 = vmand %vm665_vm15, %vm1935_vm0 }
  0xf3   : > { %v696_v8 = vsel %vm680_vm2, %v164_v4, 0.0  ;;  %vm681_vm13 = vmand %vm665_vm15, %vm1942_vm4  ;;  %vm336_vm15 = vcmp.lt.s32.totalorder %v1257_v12, %v1300_v24 }
  0xf4   : > { %712 = vst [vmem:[%s1411_s14 + $0x30] sm:$0xff] %v696_v8  ;;  %v697_v9 = vsel %vm681_vm13, %v165_v6, 0.0  ;;  %vm256_vm6 = vmand %vm238_vm1, %vm248_vm3  ;;  %vm370_vm13 = vcmp.ge.s32.totalorder %v1257_v12, %v1309_v25 }
  0xf5   : > { %713 = vst [vmem:[%s1411_s14 + $0x38] sm:$0xff] %v697_v9  ;;  %vm264_vm12 = vmxor %vm256_vm6, %vm1060_vm5  ;;  %vm380_vm6 = vcmp.lt.s32.totalorder %v1257_v12, %v1311_v26 }
  0xf6   : > { %vm272_vm14 = vmand %vm1593_vm7, %vm264_vm12  ;;  %vm424_vm12 = vcmp.lt.s32.totalorder %v1257_v12, %v1324_v29 }
  0xf7   : > { %vm300_vm9 = vmand %vm282_vm11, %vm292_vm8  ;;  %vm414_vm8 = vcmp.ge.s32.totalorder %v1257_v12, %v1322_v28 }
  0xf8   : > { %vm308_vm1 = vmxor %vm300_vm9, %vm1060_vm5 }
  0xf9   : > { %vm316_vm3 = vmand %vm272_vm14, %vm308_vm1  ;;  %vm468_vm1 = vcmp.lt.s32.totalorder %v1257_v12, %v1335_v31 }
  0xfa   : > { %vm344_vm2 = vmand %vm326_vm10, %vm336_vm15  ;;  %vm458_vm15 = vcmp.ge.s32.totalorder %v1257_v12, %v1333_v30 }
  0xfb   : > { %vm352_vm4 = vmxor %vm344_vm2, %vm1060_vm5 }
  0xfc   : > { %vm360_vm7 = vmand %vm316_vm3, %vm352_vm4 }
  0xfd   : > { %vm388_vm11 = vmand %vm370_vm13, %vm380_vm6  ;;  %vm502_vm13 = vcmp.ge.s32.totalorder %v1257_v12, %v1346_v33  ;;  %vm512_vm6 = vcmp.lt.s32.totalorder %v1257_v12, %v1348_v34 }
  0xfe   : > { %vm396_vm9 = vmxor %vm388_vm11, %vm1060_vm5 }
  0xff   : > { %vm404_vm14 = vmand %vm360_vm7, %vm396_vm9  ;;  %vm556_vm9 = vcmp.lt.s32.totalorder %v1257_v12, %v1363_v36 }
 0x100   : > { %vm432_vm10 = vmand %vm414_vm8, %vm424_vm12  ;;  %vm546_vm12 = vcmp.ge.s32.totalorder %v1257_v12, %v1361_v35 }
 0x101   : > { %vm440_vm2 = vmxor %vm432_vm10, %vm1060_vm5 }
 0x102   : > { %vm448_vm4 = vmand %vm404_vm14, %vm440_vm2  ;;  %vm600_vm2 = vcmp.lt.s32.totalorder %v1257_v12, %v1380_v39 }
 0x103   : > { %vm476_vm3 = vmand %vm458_vm15, %vm468_vm1  ;;  %vm590_vm1 = vcmp.ge.s32.totalorder %v1257_v12, %v1378_v38  ;;  %v167_v12 = vld [vmem:[%s1226_s12 + $0x48] sm:$0xff] }
 0x104   : > { %vm484_vm11 = vmxor %vm476_vm3, %vm1060_vm5 }
 0x105   : > { %vm492_vm7 = vmand %vm448_vm4, %vm484_vm11  ;;  %vm213_vm11 = vcmp.lt.s32.totalorder %v1260_v13, %v1272_v17 }
 0x106   : > { %vm520_vm8 = vmand %vm502_vm13, %vm512_vm6  ;;  %vm203_vm6 = vcmp.ge.s32.totalorder %v1260_v13, %v1268_v16 }
 0x107   : > { %vm528_vm14 = vmxor %vm520_vm8, %vm1060_vm5 }
 0x108   : > { %vm536_vm10 = vmand %vm492_vm7, %vm528_vm14 }
 0x109   : > { %vm564_vm15 = vmand %vm546_vm12, %vm556_vm9 }
 0x10a   : > { %vm572_vm4 = vmxor %vm564_vm15, %vm1060_vm5  ;;  %vm249_vm15 = vcmp.lt.s32.totalorder %v1260_v13, %v1276_v19 }
 0x10b   : > { %vm580_vm3 = vmand %vm536_vm10, %vm572_vm4  ;;  %vm239_vm10 = vcmp.ge.s32.totalorder %v1260_v13, %v1274_v18 }
 0x10c   : > { %vm608_vm13 = vmand %vm590_vm1, %vm600_vm2  ;;  %vm1945_vm2 = vnez %v1932_v54 }
 0x10d   : > { %vm616_vm7 = vmxor %vm608_vm13, %vm1060_vm5  ;;  %vm283_vm13 = vcmp.ge.s32.totalorder %v1260_v13, %v1284_v20 }
 0x10e   : > { %vm624_vm8 = vmand %vm580_vm3, %vm616_vm7 }
 0x10f   : > { %v658_v11 = vsel %vm624_vm8, 1, %v1061_v46  ;;  %vm221_vm12 = vmand %vm203_vm6, %vm213_vm11  ;;  %vm293_vm6 = vcmp.lt.s32.totalorder %v1260_v13, %v1286_v21 }
 0x110   : > { %vm666_vm9 = vcmp.eq.s32.totalorder %v658_v11, 1  ;;  %vm1658_vm14 = vmxor %vm221_vm12, %vm1060_vm5  ;;  %vm327_vm12 = vcmp.ge.s32.totalorder %v1260_v13, %v1298_v23 }
 0x111   : > { %vm682_vm1 = vmand %vm666_vm9, %vm1935_vm0 }
 0x112   : > { %v698_v27 = vsel %vm682_vm1, %v166_v10, 0.0  ;;  %vm683_vm4 = vmand %vm666_vm9, %vm1945_vm2  ;;  %vm337_vm9 = vcmp.lt.s32.totalorder %v1260_v13, %v1300_v24 }
 0x113   : > { %714 = vst [vmem:[%s1411_s14 + $0x40] sm:$0xff] %v698_v27  ;;  %v699_v32 = vsel %vm683_vm4, %v167_v12, 0.0  ;;  %vm257_vm3 = vmand %vm239_vm10, %vm249_vm15  ;;  %vm371_vm4 = vcmp.ge.s32.totalorder %v1260_v13, %v1309_v25 }
 0x114   : > { %715 = vst [vmem:[%s1411_s14 + $0x48] sm:$0xff] %v699_v32  ;;  %vm265_vm11 = vmxor %vm257_vm3, %vm1060_vm5  ;;  %vm381_vm3 = vcmp.lt.s32.totalorder %v1260_v13, %v1311_v26 }
 0x115   : > { %vm273_vm7 = vmand %vm1658_vm14, %vm265_vm11  ;;  %vm425_vm11 = vcmp.lt.s32.totalorder %v1260_v13, %v1324_v29 }
 0x116   : > { %vm301_vm8 = vmand %vm283_vm13, %vm293_vm6  ;;  %vm415_vm6 = vcmp.ge.s32.totalorder %v1260_v13, %v1322_v28 }
 0x117   : > { %vm309_vm10 = vmxor %vm301_vm8, %vm1060_vm5 }
 0x118   : > { %vm317_vm15 = vmand %vm273_vm7, %vm309_vm10  ;;  %vm469_vm10 = vcmp.lt.s32.totalorder %v1260_v13, %v1335_v31 }
 0x119   : > { %vm345_vm1 = vmand %vm327_vm12, %vm337_vm9  ;;  %vm459_vm9 = vcmp.ge.s32.totalorder %v1260_v13, %v1333_v30 }
 0x11a   : > { %vm353_vm2 = vmxor %vm345_vm1, %vm1060_vm5 }
 0x11b   : > { %vm361_vm14 = vmand %vm317_vm15, %vm353_vm2 }
 0x11c   : > { %vm389_vm13 = vmand %vm371_vm4, %vm381_vm3  ;;  %vm503_vm4 = vcmp.ge.s32.totalorder %v1260_v13, %v1346_v33  ;;  %vm513_vm3 = vcmp.lt.s32.totalorder %v1260_v13, %v1348_v34 }
 0x11d   : > { %vm397_vm8 = vmxor %vm389_vm13, %vm1060_vm5 }
 0x11e   : > { %vm405_vm7 = vmand %vm361_vm14, %vm397_vm8  ;;  %vm557_vm8 = vcmp.lt.s32.totalorder %v1260_v13, %v1363_v36 }
 0x11f   : > { %vm433_vm12 = vmand %vm415_vm6, %vm425_vm11  ;;  %vm547_vm11 = vcmp.ge.s32.totalorder %v1260_v13, %v1361_v35 }
 0x120   : > { %vm441_vm1 = vmxor %vm433_vm12, %vm1060_vm5 }
 0x121   : > { %vm449_vm2 = vmand %vm405_vm7, %vm441_vm1  ;;  %vm601_vm1 = vcmp.lt.s32.totalorder %v1260_v13, %v1380_v39 }
 0x122   : > { %vm477_vm15 = vmand %vm459_vm9, %vm469_vm10  ;;  %vm591_vm10 = vcmp.ge.s32.totalorder %v1260_v13, %v1378_v38  ;;  %v169_v13 = vld [vmem:[%s1226_s12 + $0x58] sm:$0xff] }
 0x123   : > { %vm485_vm13 = vmxor %vm477_vm15, %vm1060_vm5 }
 0x124   : > { %vm493_vm14 = vmand %vm449_vm2, %vm485_vm13  ;;  %vm214_vm13 = vcmp.lt.s32.totalorder %v1263_v14, %v1272_v17 }
 0x125   : > { %vm521_vm6 = vmand %vm503_vm4, %vm513_vm3  ;;  %vm204_vm3 = vcmp.ge.s32.totalorder %v1263_v14, %v1268_v16 }
 0x126   : > { %vm529_vm7 = vmxor %vm521_vm6, %vm1060_vm5 }
 0x127   : > { %vm537_vm12 = vmand %vm493_vm14, %vm529_vm7 }
 0x128   : > { %vm565_vm9 = vmand %vm547_vm11, %vm557_vm8 }
 0x129   : > { %vm573_vm2 = vmxor %vm565_vm9, %vm1060_vm5  ;;  %vm250_vm9 = vcmp.lt.s32.totalorder %v1263_v14, %v1276_v19 }
 0x12a   : > { %vm581_vm15 = vmand %vm537_vm12, %vm573_vm2  ;;  %vm240_vm12 = vcmp.ge.s32.totalorder %v1263_v14, %v1274_v18 }
 0x12b   : > { %vm609_vm4 = vmand %vm591_vm10, %vm601_vm1  ;;  %vm1948_vm1 = vnez %v1932_v54 }
 0x12c   : > { %vm617_vm14 = vmxor %vm609_vm4, %vm1060_vm5  ;;  %vm284_vm4 = vcmp.ge.s32.totalorder %v1263_v14, %v1284_v20 }
 0x12d   : > { %vm625_vm6 = vmand %vm581_vm15, %vm617_vm14 }
 0x12e   : > { %v659_v40 = vsel %vm625_vm6, 1, %v1061_v46  ;;  %vm222_vm11 = vmand %vm204_vm3, %vm214_vm13  ;;  %vm294_vm3 = vcmp.lt.s32.totalorder %v1263_v14, %v1286_v21 }
 0x12f   : > { %vm667_vm8 = vcmp.eq.s32.totalorder %v659_v40, 1  ;;  %vm1723_vm7 = vmxor %vm222_vm11, %vm1060_vm5  ;;  %vm328_vm11 = vcmp.ge.s32.totalorder %v1263_v14, %v1298_v23 }
 0x130   : > { %vm684_vm10 = vmand %vm667_vm8, %vm1935_vm0 }
 0x131   : > { %v700_v42 = vsel %vm684_vm10, %v168_v37, 0.0  ;;  %vm685_vm2 = vmand %vm667_vm8, %vm1948_vm1  ;;  %vm338_vm8 = vcmp.lt.s32.totalorder %v1263_v14, %v1300_v24 }
 0x132   : > { %716 = vst [vmem:[%s1411_s14 + $0x50] sm:$0xff] %v700_v42  ;;  %v701_v43 = vsel %vm685_vm2, %v169_v13, 0.0  ;;  %vm258_vm15 = vmand %vm240_vm12, %vm250_vm9  ;;  %vm372_vm2 = vcmp.ge.s32.totalorder %v1263_v14, %v1309_v25 }
 0x133   : > { %717 = vst [vmem:[%s1411_s14 + $0x58] sm:$0xff] %v701_v43  ;;  %vm266_vm13 = vmxor %vm258_vm15, %vm1060_vm5  ;;  %vm382_vm15 = vcmp.lt.s32.totalorder %v1263_v14, %v1311_v26 }
 0x134   : > { %vm274_vm14 = vmand %vm1723_vm7, %vm266_vm13  ;;  %vm426_vm13 = vcmp.lt.s32.totalorder %v1263_v14, %v1324_v29 }
 0x135   : > { %vm302_vm6 = vmand %vm284_vm4, %vm294_vm3  ;;  %vm416_vm3 = vcmp.ge.s32.totalorder %v1263_v14, %v1322_v28 }
 0x136   : > { %vm310_vm12 = vmxor %vm302_vm6, %vm1060_vm5 }
 0x137   : > { %vm318_vm9 = vmand %vm274_vm14, %vm310_vm12  ;;  %vm470_vm12 = vcmp.lt.s32.totalorder %v1263_v14, %v1335_v31 }
 0x138   : > { %vm346_vm10 = vmand %vm328_vm11, %vm338_vm8  ;;  %vm460_vm8 = vcmp.ge.s32.totalorder %v1263_v14, %v1333_v30 }
 0x139   : > { %vm354_vm1 = vmxor %vm346_vm10, %vm1060_vm5 }
 0x13a   : > { %vm362_vm7 = vmand %vm318_vm9, %vm354_vm1 }
 0x13b   : > { %vm390_vm4 = vmand %vm372_vm2, %vm382_vm15  ;;  %vm504_vm2 = vcmp.ge.s32.totalorder %v1263_v14, %v1346_v33  ;;  %vm514_vm15 = vcmp.lt.s32.totalorder %v1263_v14, %v1348_v34 }
 0x13c   : > { %vm398_vm6 = vmxor %vm390_vm4, %vm1060_vm5 }
 0x13d   : > { %vm406_vm14 = vmand %vm362_vm7, %vm398_vm6  ;;  %vm558_vm6 = vcmp.lt.s32.totalorder %v1263_v14, %v1363_v36 }
 0x13e   : > { %vm434_vm11 = vmand %vm416_vm3, %vm426_vm13  ;;  %vm548_vm13 = vcmp.ge.s32.totalorder %v1263_v14, %v1361_v35 }
 0x13f   : > { %vm442_vm10 = vmxor %vm434_vm11, %vm1060_vm5 }
 0x140   : > { %vm450_vm1 = vmand %vm406_vm14, %vm442_vm10  ;;  %vm602_vm10 = vcmp.lt.s32.totalorder %v1263_v14, %v1380_v39 }
 0x141   : > { %vm478_vm9 = vmand %vm460_vm8, %vm470_vm12  ;;  %vm592_vm12 = vcmp.ge.s32.totalorder %v1263_v14, %v1378_v38  ;;  %v171_v14 = vld [vmem:[%s1226_s12 + $0x68] sm:$0xff] }
 0x142   : > { %vm486_vm4 = vmxor %vm478_vm9, %vm1060_vm5 }
 0x143   : > { %vm494_vm7 = vmand %vm450_vm1, %vm486_vm4  ;;  %vm215_vm4 = vcmp.lt.s32.totalorder %v1266_v15, %v1272_v17 }
 0x144   : > { %vm522_vm3 = vmand %vm504_vm2, %vm514_vm15  ;;  %vm205_vm15 = vcmp.ge.s32.totalorder %v1266_v15, %v1268_v16 }
 0x145   : > { %vm530_vm14 = vmxor %vm522_vm3, %vm1060_vm5 }
 0x146   : > { %vm538_vm11 = vmand %vm494_vm7, %vm530_vm14 }
 0x147   : > { %vm566_vm8 = vmand %vm548_vm13, %vm558_vm6 }
 0x148   : > { %vm574_vm1 = vmxor %vm566_vm8, %vm1060_vm5  ;;  %vm251_vm8 = vcmp.lt.s32.totalorder %v1266_v15, %v1276_v19 }
 0x149   : > { %vm582_vm9 = vmand %vm538_vm11, %vm574_vm1  ;;  %vm241_vm11 = vcmp.ge.s32.totalorder %v1266_v15, %v1274_v18  ;;  %v172_v18 = vld [vmem:[%s1226_s12 + $0x70] sm:$0xff] }
 0x14a   : > { %vm610_vm2 = vmand %vm592_vm12, %vm602_vm10  ;;  %vm1951_vm10 = vnez %v1932_v54 }
 0x14b   : > { %vm618_vm7 = vmxor %vm610_vm2, %vm1060_vm5  ;;  %vm285_vm2 = vcmp.ge.s32.totalorder %v1266_v15, %v1284_v20  ;;  %v173_v20 = vld [vmem:[%s1226_s12 + $0x78] sm:$0xff]  ;;  %s983_s12 = scalar_lea.vmem %s1857_s19, 2048 }
 0x14c   : > { %vm626_vm3 = vmand %vm582_vm9, %vm618_vm7  ;;  %p984_p10 = scmp.ne.s32.totalorder %s1857_s19, %s983_s12  ;;  %p991_p0 = scmp.lt.s32.totalorder %s989_s30, %s983_s12 }
 0x14d   : > { %v660_v45 = vsel %vm626_vm3, 1, %v1061_v46  ;;  %vm223_vm13 = vmand %vm205_vm15, %vm215_vm4  ;;  %vm295_vm15 = vcmp.lt.s32.totalorder %v1266_v15, %v1286_v21 }
 0x14e   : > { %vm668_vm6 = vcmp.eq.s32.totalorder %v660_v45, 1  ;;  %vm1788_vm14 = vmxor %vm223_vm13, %vm1060_vm5  ;;  %vm329_vm13 = vcmp.ge.s32.totalorder %v1266_v15, %v1298_v23  ;;  %p985_p2 = pnand %p984_p10, %p1953_p1  ;;  %p992_p4 = por %p991_p0, %p990_p12 }
 0x14f   : > { %vm686_vm12 = vmand %vm668_vm6, %vm1935_vm0 }
 0x150   : > { %v702_v16 = vsel %vm686_vm12, %v170_v44, 0.0  ;;  %vm687_vm1 = vmand %vm668_vm6, %vm1951_vm10  ;;  %vm339_vm6 = vcmp.lt.s32.totalorder %v1266_v15, %v1300_v24  ;;  %p986_p3 = pneg %p985_p2 }
 0x151   : > { %718 = vst [vmem:[%s1411_s14 + $0x60] sm:$0xff] %v702_v16  ;;  %v703_v17 = vsel %vm687_vm1, %v171_v14, 0.0  ;;  %vm259_vm9 = vmand %vm241_vm11, %vm251_vm8  ;;  %vm373_vm1 = vcmp.ge.s32.totalorder %v1266_v15, %v1309_v25 }
 0x152   : > { %719 = vst [vmem:[%s1411_s14 + $0x68] sm:$0xff] %v703_v17  ;;  %vm267_vm4 = vmxor %vm259_vm9, %vm1060_vm5  ;;  %vm383_vm9 = vcmp.lt.s32.totalorder %v1266_v15, %v1311_v26  ;;  %p993_p6 = pnand %p992_p4, %p986_p3 }
 0x153   : > { %vm275_vm7 = vmand %vm1788_vm14, %vm267_vm4  ;;  %vm427_vm4 = vcmp.lt.s32.totalorder %v1266_v15, %v1324_v29 }
 0x154   : > { %vm303_vm3 = vmand %vm285_vm2, %vm295_vm15  ;;  %vm417_vm15 = vcmp.ge.s32.totalorder %v1266_v15, %v1322_v28 }
 0x155   : > { %vm311_vm11 = vmxor %vm303_vm3, %vm1060_vm5 }
 0x156   : > { %vm319_vm8 = vmand %vm275_vm7, %vm311_vm11  ;;  %vm471_vm11 = vcmp.lt.s32.totalorder %v1266_v15, %v1335_v31 }
 0x157   : > { %vm347_vm12 = vmand %vm329_vm13, %vm339_vm6  ;;  %vm461_vm6 = vcmp.ge.s32.totalorder %v1266_v15, %v1333_v30 }
 0x158   : > { %vm355_vm10 = vmxor %vm347_vm12, %vm1060_vm5 }
 0x159   : > { %vm363_vm14 = vmand %vm319_vm8, %vm355_vm10 }
 0x15a   : > { %vm391_vm2 = vmand %vm373_vm1, %vm383_vm9  ;;  %vm505_vm1 = vcmp.ge.s32.totalorder %v1266_v15, %v1346_v33  ;;  %vm515_vm9 = vcmp.lt.s32.totalorder %v1266_v15, %v1348_v34 }
 0x15b   : > { %vm399_vm3 = vmxor %vm391_vm2, %vm1060_vm5 }
 0x15c   : > { %vm407_vm7 = vmand %vm363_vm14, %vm399_vm3  ;;  %vm559_vm3 = vcmp.lt.s32.totalorder %v1266_v15, %v1363_v36 }
 0x15d   : > { %vm435_vm13 = vmand %vm417_vm15, %vm427_vm4  ;;  %vm549_vm4 = vcmp.ge.s32.totalorder %v1266_v15, %v1361_v35 }
 0x15e   : > { %vm443_vm12 = vmxor %vm435_vm13, %vm1060_vm5 }
 0x15f   : > { %vm451_vm10 = vmand %vm407_vm7, %vm443_vm12  ;;  %vm603_vm12 = vcmp.lt.s32.totalorder %v1266_v15, %v1380_v39 }
 0x160   : > { %vm479_vm8 = vmand %vm461_vm6, %vm471_vm11  ;;  %vm593_vm11 = vcmp.ge.s32.totalorder %v1266_v15, %v1378_v38 }
 0x161   : > { %vm487_vm14 = vmxor %vm479_vm8, %vm1060_vm5 }
 0x162   : > { %vm495_vm2 = vmand %vm451_vm10, %vm487_vm14 }
 0x163   : > { %vm523_vm15 = vmand %vm505_vm1, %vm515_vm9 }
 0x164   : > { %vm531_vm7 = vmxor %vm523_vm15, %vm1060_vm5 }
 0x165   : > { %vm539_vm13 = vmand %vm495_vm2, %vm531_vm7 }
 0x166   : > { %vm567_vm6 = vmand %vm549_vm4, %vm559_vm3 }
 0x167   : > { %vm575_vm10 = vmxor %vm567_vm6, %vm1060_vm5 }
 0x168   : > { %vm583_vm8 = vmand %vm539_vm13, %vm575_vm10 }
 0x169   : > { %vm611_vm1 = vmand %vm593_vm11, %vm603_vm12 }
 0x16a   : > { %vm619_vm9 = vmxor %vm611_vm1, %vm1060_vm5  ;;  %vm1952_vm5 = vnez %v1932_v54 }
 0x16b   : > { %vm627_vm14 = vmand %vm583_vm8, %vm619_vm9 }
 0x16c   : > { %v661_v19 = vsel %vm627_vm14, 1, %v1061_v46 }
 0x16d   : > { %vm669_vm2 = vcmp.eq.s32.totalorder %v661_v19, 1 }
 0x16e   : > { %vm688_vm15 = vmand %vm669_vm2, %vm1935_vm0 }
 0x16f   : > { %v704_v15 = vsel %vm688_vm15, %v172_v18, 0.0  ;;  %vm689_vm4 = vmand %vm669_vm2, %vm1952_vm5 }
 0x170   : > { %720 = vst [vmem:[%s1411_s14 + $0x70] sm:$0xff] %v704_v15  ;;  %v705_v21 = vsel %vm689_vm4, %v173_v20, 0.0 }
 0x171   : > { %721 = vst [vmem:[%s1411_s14 + $0x78] sm:$0xff] %v705_v21 }
 0x172   : > { %996 = shalt.err (!%p993_p6)
}
 0x173   : > { %s997_s9 = scalar_lea.hbm %s1855_s24, 2048  ;;  %s1001_s0 = scalar_lea.hbm %s1907_s5, 4096 }
 0x174   : > { %p998_p8 = scmp.ne.s32.totalorder %s1855_s24, %s997_s9  ;;  %p1002_p13 = scmp.lt.u32.totalorder %s1855_s24, %s1907_s5 }
 0x175   : > { %p1003_p5 = scmp.lt.u32.totalorder %s1001_s0, %s997_s9  ;;  %p1005_p10 = scmp.lt.u32.totalorder %s997_s9, %s1855_s24 }
 0x176   : > { %p999_p9 = pnand %p998_p8, %p1953_p1 }
 0x177   : > { %p1004_p7 = por %p1003_p5, %p1002_p13 }
 0x178   : > { %p1000_p11 = pneg %p999_p9 }
 0x179   : > { %p1006_p2 = por %p1005_p10, %p1004_p7 }
 0x17b   : > { %p1007_p3 = pnand %p1006_p2, %p1000_p11 }
 0x17d   : > { %1010 = shalt.err (!%p1007_p3)
}
 0x17e   : > { %s1063_s2 = smov 256   ;;  %s1064_s13 = smov 16  }
 0x17f   : > { %853 = dma.vmem_to_hbm [thread:$0]  (%p1953_p1), %s1857_s19, 2048, %s1855_s24, %s723_s18, %s1063_s2, %s1063_s2, %s1064_s13  }
 0x180 PF: > { %s752_s25 = sand.u32 1, %s1039_s3   ;;  %p1954_p12 = scmp.ne.s32.totalorder %s1919_s27, 0 }
 0x181   : > { %p1955_p0 = scmp.ge.s32.totalorder %s1051_s17, 2  ;;  %s753_s14 = scalar_lea.sflag [#allocation9], %s752_s25 }
 0x183   : > { %p860_p4 = pnand %p1955_p0, %p1954_p12 }
 0x185   : > { %1034 = dma.done.wait (!%p860_p4), %s753_s14, 2048  }
 0x186   : > { %1036 = vsyncadd (!%p860_p4), %s753_s14, 4294965248  ;;  %p34_p6 = scmp.ge.s32.totalorder %s1141_s20, 4   ;;  %s1956_s3 = smov %s1043_s15 }
 0x187   : > { %s1957_s15 = smov %s1047_s16  ;;  %s1958_s16 = smov %s1153_s23 }
 0x188   : > { %s1959_s17 = smov %s1141_s20  ;;  %36 = sbr.rel (!%p34_p6) target bundleno = 48 (0x30), region = 69 }
 0x18f   :  { %758 = vsyncpa [#allocation8], 1 }
 0x190   :  { %760 = vsyncpa [#allocation8 + $0x1], 1 }
 0x191   :  { %761 = vsyncpa [#allocation9], 1 }
 0x192   :  { %763 = vsyncpa [#allocation9 + $0x1], 1 }

</bundles_post_ra>
